<compile_context>
chip_gen: v5e
topology: v5e:2x2
jax: 0.10.0
libtpu: 0.0.40
codegen_flags: <defaults>
</compile_context>

<pallas_src>
import jax
import jax.numpy as jnp
from jax.experimental import pallas as pl
from jax.experimental.pallas import tpu as pltpu

K_IN = 28 * 28   # 784 — activation feature dim, fed unpadded (full-dim block)
H_PAD = 128      # hidden width 64 padded to one full lane tile
O_PAD = 128      # output width 10 padded to one full lane tile (lane-dense store)
NEG_FILL = -1e30 # padded logit columns -> effectively -inf for log_softmax


def mlp_kernel(x_ref, w1_ref, b1_ref, w2_ref, b2_ref,
               w3_ref, b3_ref, w4_ref, b4_ref, o_ref):
    # Cast the activation tile to bf16 in-register (no wrapper pre-pass).
    x = x_ref[...].astype(jnp.bfloat16)
    # fc1 + relu  (bf16 MXU inputs, f32 accumulation; elementwise stays f32)
    h = jnp.dot(x, w1_ref[...], preferred_element_type=jnp.float32)
    h = jnp.maximum(h + b1_ref[...], 0.0)
    # fc2 + relu
    h = jnp.dot(h.astype(jnp.bfloat16), w2_ref[...],
                preferred_element_type=jnp.float32)
    h = jnp.maximum(h + b2_ref[...], 0.0)
    # fc3 + relu
    h = jnp.dot(h.astype(jnp.bfloat16), w3_ref[...],
                preferred_element_type=jnp.float32)
    h = jnp.maximum(h + b3_ref[...], 0.0)
    # fc4 (no relu); padded columns carry -1e30 bias so they vanish in softmax
    logits = jnp.dot(h.astype(jnp.bfloat16), w4_ref[...],
                     preferred_element_type=jnp.float32)
    logits = logits + b4_ref[...]
    # log_softmax over the last axis (f32; EUP exp/log, XLU row reductions)
    m = jnp.max(logits, axis=-1, keepdims=True)
    shifted = logits - m
    lse = jnp.log(jnp.sum(jnp.exp(shifted), axis=-1, keepdims=True))
    o_ref[...] = shifted - lse


def prepare_params(params):
    """One-time conversion of PyTorch-shaped params: transpose to (in, out),
    pad output widths to lane tiles, cast weights to bf16 (biases stay f32).
    fc1 keeps its natural 784 input rows (no K padding needed anymore)."""
    in_dims = [K_IN, H_PAD, H_PAD, H_PAD]
    out_pads = [H_PAD, H_PAD, H_PAD, O_PAD]
    prepared = []
    for i in range(1, 5):
        w = params[f"w{i}"].T.astype(jnp.float32)   # (in, out)
        b = params[f"b{i}"].astype(jnp.float32)     # (out,)
        ip, op = in_dims[i - 1], out_pads[i - 1]
        w_p = jnp.zeros((ip, op), jnp.float32).at[:w.shape[0], :w.shape[1]].set(w)
        fill = 0.0 if i < 4 else NEG_FILL           # pad fc4 bias to -inf-ish
        b_p = jnp.full((1, op), fill, jnp.float32).at[0, :b.shape[0]].set(b)
        prepared.append(w_p.astype(jnp.bfloat16))   # MXU input dtype
        prepared.append(b_p)                        # f32 (added post-accumulate)
    return prepared


def net_forward(x, prepared, *, tb=2048):
    """x: (B, 784) float32 or bfloat16. prepared: output of prepare_params()."""
    B, F = x.shape
    assert F == K_IN
    # Batch tile: multiple of 8 sublanes, capped at `tb`.  For modest batches,
    # aim for >=2 grid steps so the "parallel" axis can split across the two
    # TensorCores on v7x; tiny batches collapse to a single small tile.
    TB = min(tb, max(8, ((pl.cdiv(B, 2) + 7) // 8) * 8))
    grid = (pl.cdiv(B, TB),)   # ragged edge block handled by Pallas masking

    x_spec = pl.BlockSpec((TB, K_IN), lambda i: (i, 0))
    out_spec = pl.BlockSpec((TB, O_PAD), lambda i: (i, 0))

    def const(shape):
        # weights/biases: same block every grid step -> stay VMEM-resident
        return pl.BlockSpec(shape, lambda i: (0, 0))

    in_specs = [
        x_spec,
        const((K_IN, H_PAD)), const((1, H_PAD)),
        const((H_PAD, H_PAD)), const((1, H_PAD)),
        const((H_PAD, H_PAD)), const((1, H_PAD)),
        const((H_PAD, O_PAD)), const((1, O_PAD)),
    ]

    out = pl.pallas_call(
        mlp_kernel,
        out_shape=jax.ShapeDtypeStruct((B, O_PAD), jnp.float32),
        grid=grid,
        in_specs=in_specs,
        out_specs=out_spec,
        compiler_params=pltpu.CompilerParams(
            dimension_semantics=("parallel",),       # megacore-shard the batch
            vmem_limit_bytes=48 * 1024 * 1024),      # headroom for TB=2048 f32-in
    )(x, *prepared)
    # TODO(synk): a fused downstream consumer (NLL loss / argmax) could read the
    # padded (B, 128) block directly and skip this layout-only slice pass.
    return out[:, :10]


def init_params(key):
    """Deterministic init mimicking nn.Linear shapes: W (out, in), b (out,)."""
    sizes = [(64, 784), (64, 64), (64, 64), (10, 64)]
    params = {}
    for i, (out_f, in_f) in enumerate(sizes, start=1):
        key, kw, kb = jax.random.split(key, 3)
        bound = 1.0 / (in_f ** 0.5)
        params[f"w{i}"] = jax.random.uniform(
            kw, (out_f, in_f), jnp.float32, -bound, bound)
        params[f"b{i}"] = jax.random.uniform(
            kb, (out_f,), jnp.float32, -bound, bound)
    return params


def net_forward_ref(x, params):
    """Pure-JAX f32 reference matching the PyTorch module."""
    h = x
    for i in (1, 2, 3):
        h = jnp.maximum(h @ params[f"w{i}"].T + params[f"b{i}"], 0.0)
    logits = h @ params["w4"].T + params["b4"]
    return jax.nn.log_softmax(logits, axis=1)


if __name__ == "__main__":
    key = jax.random.PRNGKey(0)
    params = init_params(key)
    prepared = prepare_params(params)   # done once, outside the hot path
    x = jax.random.normal(jax.random.PRNGKey(1), (8, 28 * 28), jnp.float32)

    out = net_forward(x, prepared)
    out = jax.block_until_ready(out)

    # sanity: log_softmax rows must (approximately) exp-sum to 1
    row_sums = jnp.sum(jnp.exp(out), axis=1)
    assert out.shape == (8, 10)
    assert bool(jnp.all(jnp.abs(row_sums - 1.0) < 1e-3))

    # sanity: matches f32 reference within bf16-matmul tolerance
    ref = net_forward_ref(x, params)
    assert bool(jnp.max(jnp.abs(out - ref)) < 5e-2)

    print("KERNEL_OK")
</pallas_src>

<mosaic_0001>
module attributes {stable_mosaic.version = 11 : i64} {
  func.func @mlp_kernel(%arg0: i32, %arg1: memref<8x784xf32, #tpu.memory_space<vmem>>, %arg2: memref<784x128xbf16, #tpu.memory_space<vmem>>, %arg3: memref<1x128xf32, #tpu.memory_space<vmem>>, %arg4: memref<128x128xbf16, #tpu.memory_space<vmem>>, %arg5: memref<1x128xf32, #tpu.memory_space<vmem>>, %arg6: memref<128x128xbf16, #tpu.memory_space<vmem>>, %arg7: memref<1x128xf32, #tpu.memory_space<vmem>>, %arg8: memref<128x128xbf16, #tpu.memory_space<vmem>>, %arg9: memref<1x128xf32, #tpu.memory_space<vmem>>, %arg10: memref<8x128xf32, #tpu.memory_space<vmem>>) attributes {dimension_semantics = [#tpu.dimension_semantics<parallel>], iteration_bounds = array<i64: 1>, scalar_prefetch = 0 : i64, scratch_operands = 0 : i64, tpu.core_type = #tpu.core_type<tc>, window_params = [{transform_indices = @transform_0, window_bounds = array<i64: 8, 784>}, {pipeline_mode = #tpu.pipeline_mode<synchronous>, transform_indices = @transform_1, window_bounds = array<i64: 784, 128>}, {pipeline_mode = #tpu.pipeline_mode<synchronous>, transform_indices = @transform_2, window_bounds = array<i64: 1, 128>}, {pipeline_mode = #tpu.pipeline_mode<synchronous>, transform_indices = @transform_3, window_bounds = array<i64: 128, 128>}, {pipeline_mode = #tpu.pipeline_mode<synchronous>, transform_indices = @transform_4, window_bounds = array<i64: 1, 128>}, {pipeline_mode = #tpu.pipeline_mode<synchronous>, transform_indices = @transform_5, window_bounds = array<i64: 128, 128>}, {pipeline_mode = #tpu.pipeline_mode<synchronous>, transform_indices = @transform_6, window_bounds = array<i64: 1, 128>}, {pipeline_mode = #tpu.pipeline_mode<synchronous>, transform_indices = @transform_7, window_bounds = array<i64: 128, 128>}, {pipeline_mode = #tpu.pipeline_mode<synchronous>, transform_indices = @transform_8, window_bounds = array<i64: 1, 128>}, {transform_indices = @transform_9, window_bounds = array<i64: 8, 128>}]} {
    %c0 = arith.constant 0 : index
    %c0_0 = arith.constant 0 : index
    %0 = vector.load %arg1[%c0, %c0_0] : memref<8x784xf32, #tpu.memory_space<vmem>>, vector<8x784xf32>
    %1 = arith.truncf %0 : vector<8x784xf32> to vector<8x784xbf16>
    %c0_1 = arith.constant 0 : index
    %c0_2 = arith.constant 0 : index
    %2 = vector.load %arg2[%c0_1, %c0_2] : memref<784x128xbf16, #tpu.memory_space<vmem>>, vector<784x128xbf16>
    %cst = arith.constant dense<0.000000e+00> : vector<8x128xf32>
    %3 = tpu.matmul %1, %2, %cst {dimension_numbers = #tpu.dot_dimension_numbers<[1], [0], [0], [1], [0, 0, 1, 1], [], []>} : vector<8x784xbf16>, vector<784x128xbf16>, vector<8x128xf32> -> vector<8x128xf32>
    %c0_3 = arith.constant 0 : index
    %c0_4 = arith.constant 0 : index
    %4 = vector.load %arg3[%c0_3, %c0_4] : memref<1x128xf32, #tpu.memory_space<vmem>>, vector<1x128xf32>
    %5 = vector.broadcast %4 : vector<1x128xf32> to vector<8x128xf32>
    %6 = arith.addf %3, %5 : vector<8x128xf32>
    %cst_5 = arith.constant 0.000000e+00 : f32
    %7 = vector.broadcast %cst_5 : f32 to vector<8x128xf32>
    %8 = arith.maximumf %6, %7 : vector<8x128xf32>
    %9 = arith.truncf %8 : vector<8x128xf32> to vector<8x128xbf16>
    %c0_6 = arith.constant 0 : index
    %c0_7 = arith.constant 0 : index
    %10 = vector.load %arg4[%c0_6, %c0_7] : memref<128x128xbf16, #tpu.memory_space<vmem>>, vector<128x128xbf16>
    %cst_8 = arith.constant dense<0.000000e+00> : vector<8x128xf32>
    %11 = tpu.matmul %9, %10, %cst_8 {dimension_numbers = #tpu.dot_dimension_numbers<[1], [0], [0], [1], [0, 0, 1, 1], [], []>} : vector<8x128xbf16>, vector<128x128xbf16>, vector<8x128xf32> -> vector<8x128xf32>
    %c0_9 = arith.constant 0 : index
    %c0_10 = arith.constant 0 : index
    %12 = vector.load %arg5[%c0_9, %c0_10] : memref<1x128xf32, #tpu.memory_space<vmem>>, vector<1x128xf32>
    %13 = vector.broadcast %12 : vector<1x128xf32> to vector<8x128xf32>
    %14 = arith.addf %11, %13 : vector<8x128xf32>
    %cst_11 = arith.constant 0.000000e+00 : f32
    %15 = vector.broadcast %cst_11 : f32 to vector<8x128xf32>
    %16 = arith.maximumf %14, %15 : vector<8x128xf32>
    %17 = arith.truncf %16 : vector<8x128xf32> to vector<8x128xbf16>
    %c0_12 = arith.constant 0 : index
    %c0_13 = arith.constant 0 : index
    %18 = vector.load %arg6[%c0_12, %c0_13] : memref<128x128xbf16, #tpu.memory_space<vmem>>, vector<128x128xbf16>
    %cst_14 = arith.constant dense<0.000000e+00> : vector<8x128xf32>
    %19 = tpu.matmul %17, %18, %cst_14 {dimension_numbers = #tpu.dot_dimension_numbers<[1], [0], [0], [1], [0, 0, 1, 1], [], []>} : vector<8x128xbf16>, vector<128x128xbf16>, vector<8x128xf32> -> vector<8x128xf32>
    %c0_15 = arith.constant 0 : index
    %c0_16 = arith.constant 0 : index
    %20 = vector.load %arg7[%c0_15, %c0_16] : memref<1x128xf32, #tpu.memory_space<vmem>>, vector<1x128xf32>
    %21 = vector.broadcast %20 : vector<1x128xf32> to vector<8x128xf32>
    %22 = arith.addf %19, %21 : vector<8x128xf32>
    %cst_17 = arith.constant 0.000000e+00 : f32
    %23 = vector.broadcast %cst_17 : f32 to vector<8x128xf32>
    %24 = arith.maximumf %22, %23 : vector<8x128xf32>
    %25 = arith.truncf %24 : vector<8x128xf32> to vector<8x128xbf16>
    %c0_18 = arith.constant 0 : index
    %c0_19 = arith.constant 0 : index
    %26 = vector.load %arg8[%c0_18, %c0_19] : memref<128x128xbf16, #tpu.memory_space<vmem>>, vector<128x128xbf16>
    %cst_20 = arith.constant dense<0.000000e+00> : vector<8x128xf32>
    %27 = tpu.matmul %25, %26, %cst_20 {dimension_numbers = #tpu.dot_dimension_numbers<[1], [0], [0], [1], [0, 0, 1, 1], [], []>} : vector<8x128xbf16>, vector<128x128xbf16>, vector<8x128xf32> -> vector<8x128xf32>
    %c0_21 = arith.constant 0 : index
    %c0_22 = arith.constant 0 : index
    %28 = vector.load %arg9[%c0_21, %c0_22] : memref<1x128xf32, #tpu.memory_space<vmem>>, vector<1x128xf32>
    %29 = vector.broadcast %28 : vector<1x128xf32> to vector<8x128xf32>
    %30 = arith.addf %27, %29 : vector<8x128xf32>
    %cst_23 = arith.constant dense<0xFF800000> : vector<8xf32>
    %31 = vector.multi_reduction <maximumf>, %30, %cst_23 [1] : vector<8x128xf32> to vector<8xf32>
    %32 = vector.shape_cast %31 : vector<8xf32> to vector<8x1xf32>
    %33 = vector.broadcast %32 : vector<8x1xf32> to vector<8x128xf32>
    %34 = arith.subf %30, %33 : vector<8x128xf32>
    %35 = math.exp %34 : vector<8x128xf32>
    %cst_24 = arith.constant dense<0.000000e+00> : vector<8xf32>
    %36 = vector.multi_reduction <add>, %35, %cst_24 [1] : vector<8x128xf32> to vector<8xf32>
    %37 = vector.shape_cast %36 : vector<8xf32> to vector<8x1xf32>
    %38 = math.log %37 : vector<8x1xf32>
    %39 = vector.broadcast %38 : vector<8x1xf32> to vector<8x128xf32>
    %40 = arith.subf %34, %39 : vector<8x128xf32>
    %c0_25 = arith.constant 0 : index
    %c0_26 = arith.constant 0 : index
    %41 = vector.load %arg10[%c0_25, %c0_26] : memref<8x128xf32, #tpu.memory_space<vmem>>, vector<8x128xf32>
    tpu.vector_store %arg10[%c0_25, %c0_26], %40 {strides = array<i32>} : memref<8x128xf32, #tpu.memory_space<vmem>>, vector<8x128xf32>,
    return
  }
  func.func @transform_0(%arg0: i32) -> (i32, i32) {
    %c0_i32 = arith.constant 0 : i32
    %c0_i32_0 = arith.constant 0 : i32
    return %arg0, %c0_i32 : i32, i32
  }
  func.func @transform_1(%arg0: i32) -> (i32, i32) {
    %c0_i32 = arith.constant 0 : i32
    %c0_i32_0 = arith.constant 0 : i32
    %c0_i32_1 = arith.constant 0 : i32
    return %c0_i32, %c0_i32_0 : i32, i32
  }
  func.func @transform_2(%arg0: i32) -> (i32, i32) {
    %c0_i32 = arith.constant 0 : i32
    %c0_i32_0 = arith.constant 0 : i32
    %c0_i32_1 = arith.constant 0 : i32
    return %c0_i32, %c0_i32_0 : i32, i32
  }
  func.func @transform_3(%arg0: i32) -> (i32, i32) {
    %c0_i32 = arith.constant 0 : i32
    %c0_i32_0 = arith.constant 0 : i32
    %c0_i32_1 = arith.constant 0 : i32
    return %c0_i32, %c0_i32_0 : i32, i32
  }
  func.func @transform_4(%arg0: i32) -> (i32, i32) {
    %c0_i32 = arith.constant 0 : i32
    %c0_i32_0 = arith.constant 0 : i32
    %c0_i32_1 = arith.constant 0 : i32
    return %c0_i32, %c0_i32_0 : i32, i32
  }
  func.func @transform_5(%arg0: i32) -> (i32, i32) {
    %c0_i32 = arith.constant 0 : i32
    %c0_i32_0 = arith.constant 0 : i32
    %c0_i32_1 = arith.constant 0 : i32
    return %c0_i32, %c0_i32_0 : i32, i32
  }
  func.func @transform_6(%arg0: i32) -> (i32, i32) {
    %c0_i32 = arith.constant 0 : i32
    %c0_i32_0 = arith.constant 0 : i32
    %c0_i32_1 = arith.constant 0 : i32
    return %c0_i32, %c0_i32_0 : i32, i32
  }
  func.func @transform_7(%arg0: i32) -> (i32, i32) {
    %c0_i32 = arith.constant 0 : i32
    %c0_i32_0 = arith.constant 0 : i32
    %c0_i32_1 = arith.constant 0 : i32
    return %c0_i32, %c0_i32_0 : i32, i32
  }
  func.func @transform_8(%arg0: i32) -> (i32, i32) {
    %c0_i32 = arith.constant 0 : i32
    %c0_i32_0 = arith.constant 0 : i32
    %c0_i32_1 = arith.constant 0 : i32
    return %c0_i32, %c0_i32_0 : i32, i32
  }
  func.func @transform_9(%arg0: i32) -> (i32, i32) {
    %c0_i32 = arith.constant 0 : i32
    %c0_i32_0 = arith.constant 0 : i32
    return %arg0, %c0_i32 : i32, i32
  }
}

</mosaic_0001>

<bundles_post_ra>
// kernel: tpu_custom_call.1
= control target key start
LH: loop header
LB: loop body
LE: loop exit
PB: predicated region body
PF: predicated region fallthrough
CT: control target
= control target key end

     0   :  { %14 = vsyncpa [#allocation3], 0  ;;  %s1516_s0 = inlined_call_operand.hbm [shape: f32[8,784], index: 0, kind: input, shape index: {}]   ;;  %s1517_s1 = inlined_call_operand.hbm [shape: bf16[784,128], index: 1, kind: input, shape index: {}]   ;;  %s1518_s2 = inlined_call_operand.vmem [shape: f32[1,128], index: 2, kind: input, shape index: {}]   ;;  %s1519_s3 = inlined_call_operand.hbm [shape: bf16[128,128], index: 3, kind: input, shape index: {}]   ;;  %s1520_s4 = inlined_call_operand.vmem [shape: f32[1,128], index: 4, kind: input, shape index: {}]   ;;  %s1521_s5 = inlined_call_operand.hbm [shape: bf16[128,128], index: 5, kind: input, shape index: {}]   ;;  %s1522_s6 = inlined_call_operand.vmem [shape: f32[1,128], index: 6, kind: input, shape index: {}]   ;;  %s1523_s7 = inlined_call_operand.hbm [shape: bf16[128,128], index: 7, kind: input, shape index: {}]   ;;  %s1524_s8 = inlined_call_operand.vmem [shape: f32[1,128], index: 8, kind: input, shape index: {}]   ;;  %s1525_s9 = inlined_call_operand.hbm [shape: f32[8,128], index: 9, kind: output, shape index: {}]  }
   0x1   :  { %15 = vsyncpa [#allocation6], 0 }
   0x2   :  { %16 = vsyncpa [#allocation9], 0  ;;  %s33_s11 = sshll.u32 %s1517_s1, 4  ;;  %s34_s11 = int_to_ptr.hbm [resolvable:$true] %s33_s11 }
   0x3   :  { %17 = vsyncpa [#allocation4], 0  ;;  %s1428_s12 = smov [#allocation5]   ;;  %s63_s16 = sshll.u32 %s1521_s5, 4  ;;  %s64_s16 = int_to_ptr.hbm [resolvable:$true] %s63_s16 }
   0x4   :  { %s35_s13 = sshll.u32 %s1428_s12, 4  ;;  %s1429_s17 = smov 64   ;;  %s36_s13 = int_to_ptr.vmem [resolvable:$true] %s35_s13 }
   0x5   :  { %s1430_s18 = smov 4   ;;  %s1431_s19 = smov [#allocation8]  }
   0x6   :  { %41 = dma.hbm_to_vmem [thread:$0]  %s34_s11, 6272, %s36_s13, [#allocation6], %s1429_s17, %s1429_s17, %s1430_s18  }
   0x7   :  { %s65_s20 = sshll.u32 %s1431_s19, 4  ;;  %s23_s23 = sshll.u32 %s1516_s0, 4  ;;  %s66_s20 = int_to_ptr.vmem [resolvable:$true] %s65_s20  ;;  %s24_s23 = int_to_ptr.hbm [resolvable:$true] %s23_s23 }
   0x8   :  { %71 = dma.hbm_to_vmem [thread:$0]  %s64_s16, 1024, %s66_s20, [#allocation9], %s1429_s17, %s1429_s17, %s1430_s18  }
   0x9   :  { %s48_s25 = sshll.u32 %s1519_s3, 4  ;;  %s1432_s26 = smov [#allocation2]   ;;  %s49_s25 = int_to_ptr.hbm [resolvable:$true] %s48_s25 }
   0xa   :  { %s25_s27 = sshll.u32 %s1432_s26, 4  ;;  %s1433_s5 = smov [#allocation7]   ;;  %s26_s27 = int_to_ptr.vmem [resolvable:$true] %s25_s27 }
   0xb   :  { %28 = dma.hbm_to_vmem [thread:$0]  %s24_s23, 896, %s26_s27, [#allocation3]  }
   0xc   :  { %s50_s28 = sshll.u32 %s1433_s5, 4  ;;  %s78_s10 = sshll.u32 %s1523_s7, 4  ;;  %s51_s28 = int_to_ptr.vmem [resolvable:$true] %s50_s28  ;;  %s79_s10 = int_to_ptr.hbm [resolvable:$true] %s78_s10 }
   0xd   :  { %56 = dma.hbm_to_vmem [thread:$0]  %s49_s25, 1024, %s51_s28, [#allocation6], %s1429_s17, %s1429_s17, %s1430_s18  }
   0xe   :  { %s1434_s0 = smov [#allocation10]  }
   0xf   :  { %s80_s11 = sshll.u32 %s1434_s0, 4  ;;  %s81_s11 = int_to_ptr.vmem [resolvable:$true] %s80_s11 }
  0x10   :  { %86 = dma.hbm_to_vmem [thread:$0]  %s79_s10, 1024, %s81_s11, [#allocation9], %s1429_s17, %s1429_s17, %s1430_s18  }
  0x11   :  { %1420 = dma.done.wait [#allocation3], 896  }
  0x12   :  { %1421 = vsyncadd [#allocation3], 4294966400 }
  0x13   :  { %1422 = dma.done.wait [#allocation6], 7296  }
  0x14   :  { %1423 = vsyncadd [#allocation6], 4294960000 }
  0x15   :  { %1424 = dma.done.wait [#allocation9], 2048  }
  0x16   :  { %1425 = vsyncadd [#allocation9], 4294965248  ;;  %v1194_v0 = vld [vmem:[#allocation5 + $0x38] sm:$0xff]  ;;  %v1193_v3 = vld [vmem:[#allocation5 + $0x30] sm:$0xff]  ;;  %vm520_vm0 = vcmask 130048   ;;  %s882_s19 = sshll.u32 %s1525_s9, 4  ;;  %s883_s19 = int_to_ptr.hbm [resolvable:$true] %s882_s19 }
  0x17   :  { %v1202_v1 = vld [vmem:[#allocation5 + $0x78] sm:$0xff]  ;;  %524 = vmatpush.bf16.msra.mxu0 %v1194_v0  ;;  %v1201_v4 = vld [vmem:[#allocation5 + $0x70] sm:$0xff]  ;;  %v1192_v8 = vld [vmem:[#allocation5 + $0x28] sm:$0xff] }
  0x18   :  { %v1210_v2 = vld [vmem:[#allocation5 + $0xb8] sm:$0xff]  ;;  %537 = vmatpush.bf16.msra.mxu1 %v1202_v1  ;;  %v1209_v5 = vld [vmem:[#allocation5 + $0xb0] sm:$0xff]  ;;  %v1200_v9 = vld [vmem:[#allocation5 + $0x68] sm:$0xff] }
  0x19   :  { %550 = vmatpush.bf16.msra.mxu2 %v1210_v2  ;;  %v1218_v6 = vld [vmem:[#allocation5 + $0xf8] sm:$0xff]  ;;  %v1217_v7 = vld [vmem:[#allocation5 + $0xf0] sm:$0xff]  ;;  %v1208_v10 = vld [vmem:[#allocation5 + $0xa8] sm:$0xff] }
  0x1a   :  { %563 = vmatpush.bf16.msra.mxu3 %v1218_v6  ;;  %v1216_v11 = vld [vmem:[#allocation5 + $0xe8] sm:$0xff]  ;;  %v1191_v12 = vld [vmem:[#allocation5 + $0x20] sm:$0xff]  ;;  %v1190_v16 = vld [vmem:[#allocation5 + $0x18] sm:$0xff] }
  0x1b   :  { %525 = vmatpush.bf16.msra.mxu0 %v1193_v3  ;;  %v1199_v13 = vld [vmem:[#allocation5 + $0x60] sm:$0xff]  ;;  %v1198_v17 = vld [vmem:[#allocation5 + $0x58] sm:$0xff]  ;;  %v1189_v20 = vld [vmem:[#allocation5 + $0x10] sm:$0xff] }
  0x1c   :  { %538 = vmatpush.bf16.msra.mxu1 %v1201_v4  ;;  %v1207_v14 = vld [vmem:[#allocation5 + $0xa0] sm:$0xff]  ;;  %v1206_v18 = vld [vmem:[#allocation5 + $0x98] sm:$0xff]  ;;  %v1197_v21 = vld [vmem:[#allocation5 + $0x50] sm:$0xff] }
  0x1d   :  { %551 = vmatpush.bf16.msra.mxu2 %v1209_v5  ;;  %v1215_v15 = vld [vmem:[#allocation5 + $0xe0] sm:$0xff]  ;;  %v1214_v19 = vld [vmem:[#allocation5 + $0xd8] sm:$0xff]  ;;  %v1205_v22 = vld [vmem:[#allocation5 + $0x90] sm:$0xff] }
  0x1e   :  { %564 = vmatpush.bf16.msra.mxu3 %v1217_v7  ;;  %v1213_v23 = vld [vmem:[#allocation5 + $0xd0] sm:$0xff]  ;;  %v1188_v24 = vld [vmem:[#allocation5 + $0x8] sm:$0xff]  ;;  %v1187_v27 = vld [vmem:[#allocation5] sm:$0xff] }
  0x1f   :  { %526 = vmatpush.bf16.msra.mxu0 %v1192_v8  ;;  %v1196_v25 = vld [vmem:[#allocation5 + $0x48] sm:$0xff]  ;;  %v1195_v29 = vld [vmem:[#allocation5 + $0x40] sm:$0xff]  ;;  %v111_v31 = vld [vmem:[#allocation2 + $0x8] sm:$0xff] }
  0x20   :  { %539 = vmatpush.bf16.msra.mxu1 %v1200_v9  ;;  %v1204_v26 = vld [vmem:[#allocation5 + $0x88] sm:$0xff]  ;;  %v1226_v32 = vld [vmem:[#allocation5 + $0x138] sm:$0xff]  ;;  %v1203_v34 = vld [vmem:[#allocation5 + $0x80] sm:$0xff]  ;;  %v118_v37 = vpack.c.bf16 %v111_v31, %v111_v31 }
  0x21   :  { %552 = vmatpush.bf16.msra.mxu2 %v1208_v10  ;;  %v1212_v28 = vld [vmem:[#allocation5 + $0xc8] sm:$0xff]  ;;  %v1234_v33 = vld [vmem:[#allocation5 + $0x178] sm:$0xff]  ;;  %v1211_v38 = vld [vmem:[#allocation5 + $0xc0] sm:$0xff] }
  0x22   :  { %565 = vmatpush.bf16.msra.mxu3 %v1216_v11  ;;  %v110_v30 = vld [vmem:[#allocation2] sm:$0xff]  ;;  %v112_v35 = vld [vmem:[#allocation2 + $0x10] sm:$0xff]  ;;  %v1235_v39 = vld [vmem:[#allocation5 + $0x180] sm:$0xff] }
  0x23   :  { %527 = vmatpush.bf16.msra.mxu0 %v1191_v12  ;;  %v117_v36 = vpack.c.bf16 %v110_v30, %v110_v30  ;;  %v113_v40 = vld [vmem:[#allocation2 + $0x18] sm:$0xff]  ;;  %v1225_v41 = vld [vmem:[#allocation5 + $0x130] sm:$0xff]  ;;  %v119_v43 = vpack.c.bf16 %v112_v35, %v112_v35  ;;  %v1224_v45 = vld [vmem:[#allocation5 + $0x128] sm:$0xff] }
  0x24   :  { %540 = vmatpush.bf16.msra.mxu1 %v1199_v13  ;;  %v1233_v42 = vld [vmem:[#allocation5 + $0x170] sm:$0xff]  ;;  %v120_v44 = vpack.c.bf16 %v113_v40, %v113_v40  ;;  %v1232_v46 = vld [vmem:[#allocation5 + $0x168] sm:$0xff]  ;;  %v1223_v47 = vld [vmem:[#allocation5 + $0x120] sm:$0xff] }
  0x25   :  { %553 = vmatpush.bf16.msra.mxu2 %v1207_v14  ;;  %v1231_v48 = vld [vmem:[#allocation5 + $0x160] sm:$0xff]  ;;  %v1222_v49 = vld [vmem:[#allocation5 + $0x118] sm:$0xff]  ;;  %v1221_v52 = vld [vmem:[#allocation5 + $0x110] sm:$0xff] }
  0x26   :  { %566 = vmatpush.bf16.msra.mxu3 %v1215_v15  ;;  %v1230_v50 = vld [vmem:[#allocation5 + $0x158] sm:$0xff]  ;;  %v1229_v53 = vld [vmem:[#allocation5 + $0x150] sm:$0xff]  ;;  %v1220_v55 = vld [vmem:[#allocation5 + $0x108] sm:$0xff] }
  0x27   :  { %528 = vmatpush.bf16.msra.mxu0 %v1190_v16  ;;  %v116_v51 = vld [vmem:[#allocation2 + $0x30] sm:$0xff]  ;;  %v1228_v56 = vld [vmem:[#allocation5 + $0x148] sm:$0xff]  ;;  %v1219_v57 = vld [vmem:[#allocation5 + $0x100] sm:$0xff] }
  0x28   :  { %541 = vmatpush.bf16.msra.mxu1 %v1198_v17  ;;  %v123_v54 = vpack.c.bf16 %v116_v51, %v116_v51  ;;  %v1227_v58 = vld [vmem:[#allocation5 + $0x140] sm:$0xff]  ;;  %v114_v59 = vld [vmem:[#allocation2 + $0x20] sm:$0xff]  ;;  %v115_v60 = vld [vmem:[#allocation2 + $0x28] sm:$0xff] }
  0x29   :  { %554 = vmatpush.bf16.msra.mxu2 %v1206_v18  ;;  %v121_v61 = vpack.c.bf16 %v114_v59, %v114_v59  ;;  %v122_v62 = vpack.c.bf16 %v115_v60, %v115_v60  ;;  %v1243_v63 = vld [vmem:[#allocation7 + $0x38] sm:$0xff]  ;;  %v1242_v0 = vld [vmem:[#allocation7 + $0x30] sm:$0xff]  ;;  %v1241_v1 = vld [vmem:[#allocation7 + $0x28] sm:$0xff] }
  0x2a   :  { %567 = vmatpush.bf16.msra.mxu3 %v1214_v19  ;;  %v1240_v2 = vld [vmem:[#allocation7 + $0x20] sm:$0xff]  ;;  %v1239_v3 = vld [vmem:[#allocation7 + $0x18] sm:$0xff]  ;;  %v1238_v4 = vld [vmem:[#allocation7 + $0x10] sm:$0xff] }
  0x2b   :  { %529 = vmatpush.bf16.msra.mxu0 %v1189_v20  ;;  %v1237_v5 = vld [vmem:[#allocation7 + $0x8] sm:$0xff]  ;;  %v1236_v8 = vld [vmem:[#allocation7] sm:$0xff]  ;;  %v1251_v11 = vld [vmem:[#allocation8 + $0x38] sm:$0xff] }
  0x2c   :  { %542 = vmatpush.bf16.msra.mxu1 %v1197_v21  ;;  %v1250_v14 = vld [vmem:[#allocation8 + $0x30] sm:$0xff]  ;;  %v1268_v15 = vld [vmem:[%s1518_s2] ss:$0 sm:$0xff]  ;;  %v1249_v16 = vld [vmem:[#allocation8 + $0x28] sm:$0xff] }
  0x2d   :  { %555 = vmatpush.bf16.msra.mxu2 %v1205_v22  ;;  %v1248_v20 = vld [vmem:[#allocation8 + $0x20] sm:$0xff]  ;;  %v1247_v22 = vld [vmem:[#allocation8 + $0x18] sm:$0xff]  ;;  %v1258_v40 = vld [vmem:[#allocation10 + $0x30] sm:$0xff] }
  0x2e   :  { %568 = vmatpush.bf16.msra.mxu3 %v1213_v23  ;;  %v1253_v51 = vld [vmem:[#allocation10 + $0x8] sm:$0xff]  ;;  %v1271_v59 = vld [vmem:[%s1524_s8] ss:$0 sm:$0xff] }
  0x2f   :  { %530 = vmatpush.bf16.msra.mxu0 %v1188_v24 }
  0x30   :  { %543 = vmatpush.bf16.msra.mxu1 %v1196_v25  ;;  %v1246_v25 = vld [vmem:[#allocation8 + $0x10] sm:$0xff] }
  0x31   :  { %556 = vmatpush.bf16.msra.mxu2 %v1204_v26 }
  0x32   :  { %569 = vmatpush.bf16.msra.mxu3 %v1212_v28 }
  0x33   :  { %531 = vmatpush.bf16.msra.mxu0 %v1187_v27 }
  0x34   :  { %544 = vmatpush.bf16.msra.mxu1 %v1195_v29 }
  0x35   :  { %557 = vmatpush.bf16.msra.mxu2 %v1203_v34 }
  0x36   :  { %532 = vmatmul.bf16.vlgmr.msra.gmra.mxu0 %v117_v36  ;;  %570 = vmatpush.bf16.msra.mxu3 %v1211_v38  ;;  %v1244_v38 = vld [vmem:[#allocation8] sm:$0xff] }
  0x37   :  { %576 = vmatpush.bf16.msrb.mxu0 %v1226_v32  ;;  %545 = vmatmul.bf16.vlgmr.msra.gmra.mxu1 %v118_v37  ;;  %v1245_v37 = vld [vmem:[#allocation8 + $0x8] sm:$0xff] }
  0x38   :  { %589 = vmatpush.bf16.msrb.mxu1 %v1234_v33  ;;  %558 = vmatmul.bf16.vlgmr.msra.gmra.mxu2 %v119_v43  ;;  %v1255_v43 = vld [vmem:[#allocation10 + $0x18] sm:$0xff] }
  0x39   :  { %609 = vmatpush.bf16.msrb.mxu2 %v1235_v39  ;;  %571 = vmatmul.bf16.vlgmr.msra.gmra.mxu3 %v120_v44  ;;  %v1259_v39 = vld [vmem:[#allocation10 + $0x38] sm:$0xff]  ;;  %v1254_v44 = vld [vmem:[#allocation10 + $0x10] sm:$0xff] }
  0x3a   :  { %685 = vmatpush.bf16.msrb.mxu3 %v1243_v63 }
  0x3b   :  { %577 = vmatpush.bf16.msrb.mxu0 %v1225_v41  ;;  %v1257_v41 = vld [vmem:[#allocation10 + $0x28] sm:$0xff] }
  0x3c   :  { %590 = vmatpush.bf16.msrb.mxu1 %v1233_v42  ;;  %v1256_v42 = vld [vmem:[#allocation10 + $0x20] sm:$0xff] }
  0x3d   :  { %768 = vmatpush.bf16.msra.mxu2 %v1251_v11 }
  0x3e   :  { %686 = vmatpush.bf16.msrb.mxu3 %v1242_v0 }
  0x3f   :  { %578 = vmatpush.bf16.msrb.mxu0 %v1224_v45  ;;  %v1269_v45 = vld [vmem:[%s1520_s4] ss:$0 sm:$0xff] }
  0x40   :  { %591 = vmatpush.bf16.msrb.mxu1 %v1232_v46 }
  0x41   :  { %769 = vmatpush.bf16.msra.mxu2 %v1250_v14 }
  0x42   :  { %687 = vmatpush.bf16.msrb.mxu3 %v1241_v1 }
  0x43   :  { %579 = vmatpush.bf16.msrb.mxu0 %v1223_v47 }
  0x44   :  { %592 = vmatpush.bf16.msrb.mxu1 %v1231_v48 }
  0x45   :  { %770 = vmatpush.bf16.msra.mxu2 %v1249_v16 }
  0x46   :  { %688 = vmatpush.bf16.msrb.mxu3 %v1240_v2 }
  0x47   :  { %580 = vmatpush.bf16.msrb.mxu0 %v1222_v49 }
  0x48   :  { %593 = vmatpush.bf16.msrb.mxu1 %v1230_v50  ;;  %1090 = vmatmul.msk.bf16.vlgmr.msrb.gmra.mxu2 %vm520_vm0, %v123_v54 }
  0x49   :  { %771 = vmatpush.bf16.msra.mxu2 %v1248_v20 }
  0x4a   :  { %689 = vmatpush.bf16.msrb.mxu3 %v1239_v3 }
  0x4b   :  { %581 = vmatpush.bf16.msrb.mxu0 %v1221_v52  ;;  %v1252_v52 = vld [vmem:[#allocation10] sm:$0xff] }
  0x4c   :  { %594 = vmatpush.bf16.msrb.mxu1 %v1229_v53  ;;  %v1270_v53 = vld [vmem:[%s1522_s6] ss:$0 sm:$0xff]  ;;  %s1435_s6 = smov [#allocation11]  }
  0x4d   :  { %772 = vmatpush.bf16.msra.mxu2 %v1247_v22  ;;  %s880_s16 = sshll.u32 %s1435_s6, 4  ;;  %s881_s16 = int_to_ptr.vmem [resolvable:$true] %s880_s16 }
  0x4e   :  { %690 = vmatpush.bf16.msrb.mxu3 %v1238_v4 }
  0x4f   :  { %582 = vmatpush.bf16.msrb.mxu0 %v1220_v55 }
  0x50   :  { %595 = vmatpush.bf16.msrb.mxu1 %v1228_v56 }
  0x51   :  { %773 = vmatpush.bf16.msra.mxu2 %v1246_v25 }
  0x52   :  { %691 = vmatpush.bf16.msrb.mxu3 %v1237_v5 }
  0x53   :  { %583 = vmatpush.bf16.msrb.mxu0 %v1219_v57 }
  0x54   :  { %596 = vmatpush.bf16.msrb.mxu1 %v1227_v58 }
  0x55   :  { %774 = vmatpush.bf16.msra.mxu2 %v1245_v37 }
  0x56   :  { %584 = vmatmul.bf16.vlgmr.msrb.gmra.mxu0 %v121_v61  ;;  %692 = vmatpush.bf16.msrb.mxu3 %v1236_v8 }
  0x57   :  { %597 = vmatmul.bf16.vlgmr.msrb.gmra.mxu1 %v122_v62  ;;  %851 = vmatpush.bf16.msra.mxu0 %v1259_v39 }
  0x59   :  { %775 = vmatpush.bf16.msra.mxu2 %v1244_v38 }
  0x5b   :  { %852 = vmatpush.bf16.msra.mxu0 %v1258_v40 }
  0x5f   :  { %853 = vmatpush.bf16.msra.mxu0 %v1257_v41 }
  0x63   :  { %854 = vmatpush.bf16.msra.mxu0 %v1256_v42 }
  0x67   :  { %855 = vmatpush.bf16.msra.mxu0 %v1255_v43 }
  0x6b   :  { %856 = vmatpush.bf16.msra.mxu0 %v1254_v44 }
  0x6f   :  { %857 = vmatpush.bf16.msra.mxu0 %v1253_v51 }
  0x73   :  { %858 = vmatpush.bf16.msra.mxu0 %v1252_v52 }
  0xb3   :  { %v533_v6 = vpop.f32.mrf.mxu0 }
  0xb4   :  { %v546_v7 = vpop.f32.mrf.mxu1  ;;  %v534_v17 = vadd.f32 %v1268_v15, %v533_v6 }
  0xb6   :  { %v547_v21 = vadd.f32 %v546_v7, %v534_v17 }
  0xbb   :  { %v535_v9 = vpop.f32.mrf.mxu0  ;;  %v559_v12 = vpop.f32.mrf.mxu2 }
  0xbc   :  { %v548_v10 = vpop.f32.mrf.mxu1  ;;  %v572_v13 = vpop.f32.mrf.mxu3  ;;  %v560_v23 = vadd.f32 %v559_v12, %v547_v21 }
  0xbe   :  { %v573_v26 = vadd.f32 %v572_v13, %v560_v23 }
  0xc3   :  { %v561_v18 = vpop.f32.mrf.mxu2 }
  0xc4   :  { %v574_v19 = vpop.f32.mrf.mxu3 }
  0xcb   :  { %v611_v24 = vpop.f32.mrf.mxu2 }
  0xd3   :  { %v585_v27 = vpop.f32.mrf.mxu0  ;;  %v613_v31 = vpop.f32.mrf.mxu2 }
  0xd4   :  { %v598_v28 = vpop.f32.mrf.mxu1  ;;  %v586_v29 = vadd.f32 %v585_v27, %v573_v26 }
  0xd6   :  { %v599_v30 = vadd.f32 %v598_v28, %v586_v29 }
  0xd8   :  { %v612_v32 = vadd.f32 %v611_v24, %v599_v30 }
  0xda   :  { %v615_v33 = vmax.f32 %v612_v32, 0.0 }
  0xdb   :  { %v587_v34 = vpop.f32.mrf.mxu0 }
  0xdc   :  { %v600_v35 = vpop.f32.mrf.mxu1  ;;  %v616_v36 = vpack.c.bf16 %v615_v33, %v615_v33 }
  0xde   :  { %693 = vmatmul.bf16.vlgmr.msrb.gmra.mxu3 %v616_v36 }
 0x161   :  { %v694_v46 = vpop.f32.mrf.mxu3 }
 0x162   :  { %v695_v47 = vadd.f32 %v1269_v45, %v694_v46 }
 0x164   :  { %v698_v48 = vmax.f32 %v695_v47, 0.0 }
 0x166   :  { %v699_v49 = vpack.c.bf16 %v698_v48, %v698_v48 }
 0x168   :  { %776 = vmatmul.bf16.vlgmr.msra.gmra.mxu2 %v699_v49 }
 0x169   :  { %v696_v50 = vpop.f32.mrf.mxu3 }
 0x1eb   :  { %v777_v54 = vpop.f32.mrf.mxu2 }
 0x1ec   :  { %v778_v55 = vadd.f32 %v1270_v53, %v777_v54 }
 0x1ee   :  { %v781_v56 = vmax.f32 %v778_v55, 0.0 }
 0x1f0   :  { %v782_v57 = vpack.c.bf16 %v781_v56, %v781_v56 }
 0x1f2   :  { %859 = vmatmul.bf16.vlgmr.msra.gmra.mxu0 %v782_v57 }
 0x1f3   :  { %v779_v58 = vpop.f32.mrf.mxu2 }
 0x26f   :  { %v860_v60 = vpop.f32.mrf.mxu0 }
 0x270   :  { %v861_v61 = vadd.f32 %v1271_v59, %v860_v60 }
 0x272   :  { %864 = vmax.xlane.f32.xlu0 %v861_v61 }
 0x277   :  { %v862_v62 = vpop.f32.mrf.mxu0 }
 0x2e5   :  { %v865_v63 = vpop.xlane.xlu0 %864 }
 0x2e6   :  { %v866_v0 = vsub.f32 %v861_v61, %v865_v63 }
 0x2e8   :  { %v867_v1 = vmul.f32 1.442695, %v866_v0 }
 0x2ea   :  { %1272 = vpow2.f32 %v867_v1 }
 0x2f0   :  { %v1273_v2 = vpop.eup %1272 }
 0x2f1   :  { %869 = vadd.xlane.f32.xlu0 %v1273_v2 }
 0x364   :  { %v870_v3 = vpop.xlane.xlu0 %869 }
 0x365   :  { %1274 = vlog2.f32 %v870_v3 }
 0x36b   :  { %v1275_v4 = vpop.eup %1274 }
 0x36c   :  { %v872_v5 = vmul.f32 0.6931472, %v1275_v4 }
 0x36e   :  { %v873_v6 = vsub.f32 %v866_v0, %v872_v5 }
 0x370   :  { %874 = vst [vmem:[#allocation11] sm:$0xff] %v873_v6 }
 0x371   :  { %885 = dma.vmem_to_hbm [thread:$0]  %s881_s16, 128, %s883_s19, [#allocation4]  }
 0x372   :  { %1426 = dma.done.wait [#allocation4], 128  }
 0x373   :  { %1427 = vsyncadd [#allocation4], 4294967168 }
 0x374   :  { %890 = vsyncpa [#allocation3], 1 }
 0x375   :  { %891 = vsyncpa [#allocation6], 1 }
 0x376   :  { %892 = vsyncpa [#allocation9], 1 }
 0x377   :  { %893 = vsyncpa [#allocation4], 1 }

</bundles_post_ra>
